<compile_context>
chip_gen: v7x
topology: tpu7x:2x2x1
jax: 0.10.0
libtpu: 0.0.40
codegen_flags: <defaults>
</compile_context>

<pallas_src>
import jax
import jax.numpy as jnp
from jax.experimental import pallas as pl
from jax.experimental.pallas import tpu as pltpu


def _round_up(x, m):
    return ((x + m - 1) // m) * m


def _chamfer_tile_kernel(p1_ref, p2t_ref, xn_ref, yn_ref, d1_ref, d2_ref):
    """One grid step = (batch b, node-tile t, p2-tile m).

    p1_ref : (TN, C_pad)   tile of p1 points (nodes on sublanes, coords on lanes)
    p2t_ref: (C_pad, TM)   tile of p2 points, lane-dense
    xn_ref : (TN, 1)       ||p1_i||^2 (+inf for padded rows)
    yn_ref : (1, TM)       ||p2_j||^2 (+inf for padded columns)
    d1_ref : (1, TN)       min over this p2 tile for each p1 point (lane-dense)
    d2_ref : (1, TM)       min over this p1 tile for each p2 point
    """
    x = p1_ref[...]
    y = p2t_ref[...]
    if x.dtype != jnp.bfloat16:      # keep bf16 native on the MXU; promote others
        x = x.astype(jnp.float32)
        y = y.astype(jnp.float32)

    # Cross term on the MXU (zero-padded coord axis contributes nothing).
    cross = jnp.dot(x, y, preferred_element_type=jnp.float32)      # (TN, TM)

    # dsq[i, j] = ||x_i||^2 + ||y_j||^2 - 2 x_i.y_j   (~3 VPU ops / element).
    # +inf sentinels in xn/yn make padded rows/columns lose every min.
    dsq = xn_ref[...] + (yn_ref[...] - 2.0 * cross)                # (TN, TM)

    tn = dsq.shape[0]
    d1_ref[...] = jnp.min(dsq, axis=1).reshape(1, tn)              # (1, TN)
    d2_ref[...] = jnp.min(dsq, axis=0, keepdims=True)              # (1, TM)


def cdloss_l2(p1, p2, *, d_tile_bytes=4 * 1024 * 1024, tm_cap=2048):
    """Pallas implementation of CDLoss_L2.forward.

    p1: [B, N, 3], p2: [B, M, 3]  ->  scalar f32 loss.
    """
    B, N, C = p1.shape
    B2, M, C2 = p2.shape
    assert B == B2 and C == C2, "point clouds must share batch and coord dims"

    f32 = jnp.float32
    big = jnp.inf

    # Coordinate axis zero-padded to a full sublane group.
    C_pad = max(_round_up(C, 8), 8)

    # ---- p2 (lane) tiling: bound the tile independently of M. ----
    m_pad_total = _round_up(max(M, 128), 128)
    MT = pl.cdiv(m_pad_total, tm_cap)
    TM = _round_up(pl.cdiv(m_pad_total, MT), 128)
    M_pad = TM * MT

    # ---- p1 (sublane) tiling, budgeted against the (TN, TM) f32 tile. ----
    tn_cap = max(128, (d_tile_bytes // (TM * 4)) // 128 * 128)
    NT = pl.cdiv(N, tn_cap)
    TN = min(_round_up(pl.cdiv(N, NT), 128), tn_cap)
    N_pad = TN * NT

    # ---- Layout plumbing in the wrapper (cheap HBM ops). ----
    # Points keep their original dtype; padded entries are zero so the MXU
    # cross term is finite everywhere.
    p1p = jnp.pad(p1, ((0, 0), (0, N_pad - N), (0, C_pad - C)))
    p2t = jnp.transpose(p2, (0, 2, 1))                              # (B, C, M)
    p2tp = jnp.pad(p2t, ((0, 0), (0, C_pad - C), (0, M_pad - M)))

    # Squared norms in f32 with +inf sentinels for padded rows / columns.
    xn = jnp.sum(p1.astype(f32) * p1.astype(f32), axis=-1)          # (B, N)
    yn = jnp.sum(p2.astype(f32) * p2.astype(f32), axis=-1)          # (B, M)
    xnp = jnp.pad(xn, ((0, 0), (0, N_pad - N)), constant_values=big)
    ynp = jnp.pad(yn, ((0, 0), (0, M_pad - M)), constant_values=big)
    xnp = xnp.reshape(B, N_pad, 1)
    ynp = ynp.reshape(B, 1, M_pad)

    d1_parts, d2_parts = pl.pallas_call(
        _chamfer_tile_kernel,
        out_shape=(
            jax.ShapeDtypeStruct((B, NT, MT, 1, TN), f32),
            jax.ShapeDtypeStruct((B, NT, MT, 1, TM), f32),
        ),
        grid=(B, NT, MT),
        in_specs=[
            pl.BlockSpec((None, TN, C_pad), lambda b, t, m: (b, t, 0)),   # p1 tile
            pl.BlockSpec((None, C_pad, TM), lambda b, t, m: (b, 0, m)),   # p2 tile
            pl.BlockSpec((None, TN, 1), lambda b, t, m: (b, t, 0)),       # ||x||^2
            pl.BlockSpec((None, 1, TM), lambda b, t, m: (b, 0, m)),       # ||y||^2
        ],
        out_specs=[
            pl.BlockSpec((None, None, None, 1, TN), lambda b, t, m: (b, t, m, 0, 0)),
            pl.BlockSpec((None, None, None, 1, TM), lambda b, t, m: (b, t, m, 0, 0)),
        ],
        compiler_params=pltpu.CompilerParams(
            dimension_semantics=("parallel", "parallel", "parallel"),
            vmem_limit_bytes=32 * 1024 * 1024),
    )(p1p, p2tp, xnp, ynp)

    # Tiny cross-tile reductions + means in the wrapper (keeps the grid parallel).
    d1 = jnp.min(d1_parts[:, :, :, 0, :], axis=2)        # (B, NT, TN): min over p2 tiles
    d1 = d1.reshape(B, N_pad)[:, :N]
    d2 = jnp.min(d2_parts[:, :, :, 0, :], axis=1)        # (B, MT, TM): min over p1 tiles
    d2 = d2.reshape(B, M_pad)[:, :M]
    # Clamp: the norm+dot decomposition can yield tiny negative values.
    d1 = jnp.maximum(d1, 0.0)
    d2 = jnp.maximum(d2, 0.0)
    return jnp.mean(d1) + jnp.mean(d2)


def cdloss_l2_ref(p1, p2):
    """Pure-JAX reference matching the PyTorch module (chamfer_3DDist + means)."""
    p1 = p1.astype(jnp.float32)
    p2 = p2.astype(jnp.float32)
    diff = p1[:, :, None, :] - p2[:, None, :, :]          # (B, N, M, 3)
    dsq = jnp.sum(diff * diff, axis=-1)                   # (B, N, M)
    d1 = jnp.min(dsq, axis=2)                             # (B, N)
    d2 = jnp.min(dsq, axis=1)                             # (B, M)
    return jnp.mean(d1) + jnp.mean(d2)


if __name__ == "__main__":
    key = jax.random.PRNGKey(0)
    k = jax.random.split(key, 4)

    def check(B, N, M, k1, k2):
        p1 = jax.random.normal(k1, (B, N, 3), dtype=jnp.float32)
        p2 = jax.random.normal(k2, (B, M, 3), dtype=jnp.float32)
        loss = jax.jit(cdloss_l2)(p1, p2)
        loss = jax.block_until_ready(loss)
        ref = cdloss_l2_ref(p1, p2)
        assert jnp.allclose(loss, ref, rtol=1e-3, atol=1e-4), (B, N, M, loss, ref)

    # Small, deliberately non-aligned shapes (single tile, exercises sentinels).
    check(2, 100, 90, k[0], k[1])
    # Larger shapes exercising multiple node tiles and multiple p2 tiles.
    check(1, 1200, 2200, k[2], k[3])

    print("KERNEL_OK")
</pallas_src>

<mosaic_0001>
module attributes {stable_mosaic.version = 11 : i64} {
  func.func @_chamfer_tile_kernel(%arg0: i32, %arg1: i32, %arg2: i32, %arg3: memref<1x128x8xf32, #tpu.memory_space<vmem>>, %arg4: memref<1x8x128xf32, #tpu.memory_space<vmem>>, %arg5: memref<1x128x1xf32, #tpu.memory_space<vmem>>, %arg6: memref<1x1x128xf32, #tpu.memory_space<vmem>>, %arg7: memref<1x1x1x1x128xf32, #tpu.memory_space<vmem>>, %arg8: memref<1x1x1x1x128xf32, #tpu.memory_space<vmem>>) attributes {dimension_semantics = [#tpu.dimension_semantics<parallel>, #tpu.dimension_semantics<parallel>, #tpu.dimension_semantics<parallel>], iteration_bounds = array<i64: 2, 1, 1>, scalar_prefetch = 0 : i64, scratch_operands = 0 : i64, tpu.core_type = #tpu.core_type<tc>, window_params = [{transform_indices = @transform_0, window_bounds = array<i64: 1, 128, 8>}, {transform_indices = @transform_1, window_bounds = array<i64: 1, 8, 128>}, {transform_indices = @transform_2, window_bounds = array<i64: 1, 128, 1>}, {transform_indices = @transform_3, window_bounds = array<i64: 1, 1, 128>}, {transform_indices = @transform_4, window_bounds = array<i64: 1, 1, 1, 1, 128>}, {transform_indices = @transform_5, window_bounds = array<i64: 1, 1, 1, 1, 128>}]} {
    %c0 = arith.constant 0 : index
    %c0_0 = arith.constant 0 : index
    %c0_1 = arith.constant 0 : index
    %0 = vector.load %arg3[%c0, %c0_0, %c0_1] : memref<1x128x8xf32, #tpu.memory_space<vmem>>, vector<1x128x8xf32>
    %1 = vector.shape_cast %0 : vector<1x128x8xf32> to vector<128x8xf32>
    %c0_2 = arith.constant 0 : index
    %c0_3 = arith.constant 0 : index
    %c0_4 = arith.constant 0 : index
    %2 = vector.load %arg4[%c0_2, %c0_3, %c0_4] : memref<1x8x128xf32, #tpu.memory_space<vmem>>, vector<1x8x128xf32>
    %3 = vector.shape_cast %2 : vector<1x8x128xf32> to vector<8x128xf32>
    %cst = arith.constant dense<0.000000e+00> : vector<128x128xf32>
    %4 = tpu.matmul %1, %3, %cst {dimension_numbers = #tpu.dot_dimension_numbers<[1], [0], [0], [1], [0, 0, 1, 1], [], []>} : vector<128x8xf32>, vector<8x128xf32>, vector<128x128xf32> -> vector<128x128xf32>
    %c0_5 = arith.constant 0 : index
    %c0_6 = arith.constant 0 : index
    %c0_7 = arith.constant 0 : index
    %5 = vector.load %arg5[%c0_5, %c0_6, %c0_7] : memref<1x128x1xf32, #tpu.memory_space<vmem>>, vector<1x128x1xf32>
    %6 = vector.shape_cast %5 : vector<1x128x1xf32> to vector<128x1xf32>
    %c0_8 = arith.constant 0 : index
    %c0_9 = arith.constant 0 : index
    %c0_10 = arith.constant 0 : index
    %7 = vector.load %arg6[%c0_8, %c0_9, %c0_10] : memref<1x1x128xf32, #tpu.memory_space<vmem>>, vector<1x1x128xf32>
    %8 = vector.shape_cast %7 : vector<1x1x128xf32> to vector<1x128xf32>
    %cst_11 = arith.constant 2.000000e+00 : f32
    %9 = vector.broadcast %cst_11 : f32 to vector<128x128xf32>
    %10 = arith.mulf %9, %4 : vector<128x128xf32>
    %11 = vector.broadcast %8 : vector<1x128xf32> to vector<128x128xf32>
    %12 = arith.subf %11, %10 : vector<128x128xf32>
    %13 = vector.broadcast %6 : vector<128x1xf32> to vector<128x128xf32>
    %14 = arith.addf %13, %12 : vector<128x128xf32>
    %cst_12 = arith.constant dense<0x7F800000> : vector<128xf32>
    %15 = vector.multi_reduction <minimumf>, %14, %cst_12 [1] : vector<128x128xf32> to vector<128xf32>
    %16 = vector.shape_cast %15 : vector<128xf32> to vector<1x128xf32>
    %c0_13 = arith.constant 0 : index
    %c0_14 = arith.constant 0 : index
    %c0_15 = arith.constant 0 : index
    %c0_16 = arith.constant 0 : index
    %c0_17 = arith.constant 0 : index
    %17 = vector.load %arg7[%c0_13, %c0_14, %c0_15, %c0_16, %c0_17] : memref<1x1x1x1x128xf32, #tpu.memory_space<vmem>>, vector<1x1x1x1x128xf32>
    %18 = vector.shape_cast %17 : vector<1x1x1x1x128xf32> to vector<1x128xf32>
    %19 = vector.shape_cast %16 : vector<1x128xf32> to vector<1x1x1x1x128xf32>
    tpu.vector_store %arg7[%c0_13, %c0_14, %c0_15, %c0_16, %c0_17], %19 {strides = array<i32>} : memref<1x1x1x1x128xf32, #tpu.memory_space<vmem>>, vector<1x1x1x1x128xf32>,
    %cst_18 = arith.constant dense<0x7F800000> : vector<128xf32>
    %20 = vector.multi_reduction <minimumf>, %14, %cst_18 [0] : vector<128x128xf32> to vector<128xf32>
    %21 = vector.shape_cast %20 : vector<128xf32> to vector<1x128xf32>
    %c0_19 = arith.constant 0 : index
    %c0_20 = arith.constant 0 : index
    %c0_21 = arith.constant 0 : index
    %c0_22 = arith.constant 0 : index
    %c0_23 = arith.constant 0 : index
    %22 = vector.load %arg8[%c0_19, %c0_20, %c0_21, %c0_22, %c0_23] : memref<1x1x1x1x128xf32, #tpu.memory_space<vmem>>, vector<1x1x1x1x128xf32>
    %23 = vector.shape_cast %22 : vector<1x1x1x1x128xf32> to vector<1x128xf32>
    %24 = vector.shape_cast %21 : vector<1x128xf32> to vector<1x1x1x1x128xf32>
    tpu.vector_store %arg8[%c0_19, %c0_20, %c0_21, %c0_22, %c0_23], %24 {strides = array<i32>} : memref<1x1x1x1x128xf32, #tpu.memory_space<vmem>>, vector<1x1x1x1x128xf32>,
    return
  }
  func.func @transform_0(%arg0: i32, %arg1: i32, %arg2: i32) -> (i32, i32, i32) {
    %c0_i32 = arith.constant 0 : i32
    %c0_i32_0 = arith.constant 0 : i32
    return %arg0, %arg1, %c0_i32 : i32, i32, i32
  }
  func.func @transform_1(%arg0: i32, %arg1: i32, %arg2: i32) -> (i32, i32, i32) {
    %c0_i32 = arith.constant 0 : i32
    %c0_i32_0 = arith.constant 0 : i32
    return %arg0, %c0_i32, %arg2 : i32, i32, i32
  }
  func.func @transform_2(%arg0: i32, %arg1: i32, %arg2: i32) -> (i32, i32, i32) {
    %c0_i32 = arith.constant 0 : i32
    %c0_i32_0 = arith.constant 0 : i32
    return %arg0, %arg1, %c0_i32 : i32, i32, i32
  }
  func.func @transform_3(%arg0: i32, %arg1: i32, %arg2: i32) -> (i32, i32, i32) {
    %c0_i32 = arith.constant 0 : i32
    %c0_i32_0 = arith.constant 0 : i32
    return %arg0, %c0_i32, %arg2 : i32, i32, i32
  }
  func.func @transform_4(%arg0: i32, %arg1: i32, %arg2: i32) -> (i32, i32, i32, i32, i32) {
    %c0_i32 = arith.constant 0 : i32
    %c0_i32_0 = arith.constant 0 : i32
    %c0_i32_1 = arith.constant 0 : i32
    return %arg0, %arg1, %arg2, %c0_i32, %c0_i32_0 : i32, i32, i32, i32, i32
  }
  func.func @transform_5(%arg0: i32, %arg1: i32, %arg2: i32) -> (i32, i32, i32, i32, i32) {
    %c0_i32 = arith.constant 0 : i32
    %c0_i32_0 = arith.constant 0 : i32
    %c0_i32_1 = arith.constant 0 : i32
    return %arg0, %arg1, %arg2, %c0_i32, %c0_i32_0 : i32, i32, i32, i32, i32
  }
}

</mosaic_0001>

<bundles_post_ra>
// kernel: cdloss_l2.1
= control target key start
LH: loop header
LB: loop body
LE: loop exit
PB: predicated region body
PF: predicated region fallthrough
CT: control target
= control target key end

     0   :  { %s1263_s18 = smov 0   ;;  %s1265_s19 = smov 0   ;;  %s1421_s0 = inlined_call_operand.vmem [shape: f32[2,128,8], index: 0, kind: input, shape index: {}]   ;;  %s1422_s1 = inlined_call_operand.vmem [shape: f32[2,8,128], index: 1, kind: input, shape index: {}]   ;;  %s1423_s2 = inlined_call_operand.vmem [shape: f32[2,128,1], index: 2, kind: input, shape index: {}]   ;;  %s1424_s3 = inlined_call_operand.vmem [shape: f32[2,1,128], index: 3, kind: input, shape index: {}]   ;;  %s1425_s4 = inlined_call_operand.vmem [shape: f32[2,1,1,1,128], index: 4, kind: output, shape index: {0}]   ;;  %s1426_s5 = inlined_call_operand.vmem [shape: f32[2,1,1,1,128], index: 5, kind: output, shape index: {1}]  }
   0x1   :  { %s1267_s20 = smov 0  }
   0x2 LB: > { %s35_s21 = sadd.s32 1, %s1226_s19  ;;  %p1109_p0 = scmp.ge.s32.totalorder %s1230_s20, 1  ;;  %s1230_s20 = sphi %s1267_s20, %s16_s20   ;;  %s1226_s19 = sphi %s1265_s19, %s1428_s19   ;;  %s1222_s18 = sphi %s1263_s18, %s1427_s18  }
   0x3   : > { %p37_p1 = scmp.ge.s32.totalorder %s35_s21, 2  ;;  %p268_p2 = scmp.lt.s32.totalorder %s1230_s20, 3 }
   0x5   : > { %s1430_s21 = smov (%p37_p1, %s35_s21), 0  ;;  %p269_p3 = pnand %p1109_p0, %p268_p2 }
   0x6   : > { %p336_p4 = scmp.lt.s32.totalorder (!%p269_p3), %s1222_s18, 1  ;;  %v1232_v0 = vmov (!%p269_p3), 0   ;;  %vm403_vm0 = vcmask (!%p269_p3), 64512   ;;  %vm807_vm1 = vcmask (!%p269_p3), 130112   ;;  %vm814_vm2 = vcmask (!%p269_p3), 195712  }
   0x7   : > { %272 = sbr.rel (%p269_p3) target bundleno = 417 (0x1a1), region = 36  ;;  %1207 = vset.pattern.permute.xlu1 (!%p269_p3), %v1232_v0  ;;  %1206 = vset.pattern.permute.xlu0 (!%p269_p3), %v1232_v0  ;;  %vm821_vm3 = vcmask (!%p269_p3), 261312   ;;  %vm828_vm4 = vcmask (!%p269_p3), 326912   ;;  %vm835_vm5 = vcmask (!%p269_p3), 392512   ;;  %vm842_vm6 = vcmask (!%p269_p3), 458112  }
   0x8   : > { %vm849_vm7 = vcmask (!%p269_p3), 523712   ;;  %vm856_vm8 = vcmask (!%p269_p3), 589312   ;;  %vm863_vm9 = vcmask (!%p269_p3), 654912   ;;  %vm870_vm10 = vcmask (!%p269_p3), 720512  }
   0x9   : > { %vm877_vm11 = vcmask (!%p269_p3), 786112   ;;  %vm884_vm12 = vcmask (!%p269_p3), 851712   ;;  %vm891_vm13 = vcmask (!%p269_p3), 917312   ;;  %vm898_vm14 = vcmask (!%p269_p3), 982912  }
   0xa   : > { %vm905_vm15 = vcmask (!%p269_p3), 1048512  }
   0xe   : > { %s1432_s18 = smov (!%p336_p4, %s1222_s18), 1 }
   0xf   : > { %s1134_s22 = sshll.u32 %s1432_s18, 7  ;;  %s1112_s23 = sshll.u32 %s1432_s18, 3 }
  0x10   : > { %s1288_s26 = scalar_lea.vmem %s1421_s0, %s1134_s22  ;;  %s351_s29 = scalar_lea.vmem %s1422_s1, %s1112_s23 }
  0x11   : > { %v402_v1 = vld [vmem:[%s351_s29] sm:$0xff]  ;;  %v387_v4 = vld [vmem:[%s1288_s26 + $0x8] sm:$0xff]  ;;  %v388_v6 = vld [vmem:[%s1288_s26 + $0x10] sm:$0xff]  ;;  %s1302_s7 = scalar_lea.vmem %s1423_s2, %s1134_s22  ;;  %s367_s10 = scalar_lea.vmem %s1424_s3, %s1432_s18 }
  0x12   : > { %v386_v2 = vld [vmem:[%s1288_s26] sm:$0xff]  ;;  %1153 = vmatprep.subr.mxu0 %v402_v1  ;;  %1179 = vmatprep.subr.mxu1 %v402_v1  ;;  %v395_v5 = vld [vmem:[%s1288_s26 + $0x48] sm:$0xff]  ;;  %v396_v7 = vld [vmem:[%s1288_s26 + $0x50] sm:$0xff]  ;;  %s385_s13 = scalar_lea.vmem %s1426_s5, %s1432_s18  ;;  %s376_s16 = scalar_lea.vmem %s1425_s4, %s1432_s18 }
  0x13   : > { %v394_v3 = vld [vmem:[%s1288_s26 + $0x40] sm:$0xff]  ;;  %1154 = vmatpush3.msra.mxu0 %v402_v1  ;;  %1180 = vmatpush3.msra.mxu1 %v402_v1  ;;  %v389_v8 = vld [vmem:[%s1288_s26 + $0x18] sm:$0xff]  ;;  %v599_v12 = vld [vmem:[%s1302_s7 + $0x10] sm:$0xff] }
  0x14   : > { %1155 = vmatprep.mubr.msk.f32.mxu0 %vm403_vm0, %v386_v2  ;;  %1167 = vmatprep.mubr.msk.f32.mxu1 %vm403_vm0, %v394_v3  ;;  %v397_v9 = vld [vmem:[%s1288_s26 + $0x58] sm:$0xff]  ;;  %v390_v10 = vld [vmem:[%s1288_s26 + $0x20] sm:$0xff]  ;;  %v391_v15 = vld [vmem:[%s1288_s26 + $0x28] sm:$0xff] }
  0x15   : > { %1156 = vmatmul.mubr.msk.f32.vlgmr.msra.gmra.mrb[0].mxu0 %vm403_vm0, %v387_v4  ;;  %1168 = vmatmul.mubr.msk.f32.vlgmr.msra.gmra.mrb[0].mxu1 %vm403_vm0, %v395_v5  ;;  %v398_v11 = vld [vmem:[%s1288_s26 + $0x60] sm:$0xff]  ;;  %v600_v14 = vld [vmem:[%s1302_s7 + $0x18] sm:$0xff]  ;;  %v399_v16 = vld [vmem:[%s1288_s26 + $0x68] sm:$0xff] }
  0x16   : > { %1158 = vmatprep.mubr.msk.f32.mxu0 %vm403_vm0, %v388_v6  ;;  %1170 = vmatprep.mubr.msk.f32.mxu1 %vm403_vm0, %v396_v7  ;;  %v597_v13 = vld [vmem:[%s1302_s7] sm:$0xff]  ;;  %v392_v17 = vld [vmem:[%s1288_s26 + $0x30] sm:$0xff]  ;;  %v598_v19 = vld [vmem:[%s1302_s7 + $0x8] sm:$0xff] }
  0x17   : > { %664 = vperm.xlu1 %1207, %v599_v12   ;;  %v400_v18 = vld [vmem:[%s1288_s26 + $0x70] sm:$0xff]  ;;  %654 = vperm.xlu0 %1206, %v597_v13   ;;  %v602_v20 = vld [vmem:[%s1302_s7 + $0x28] sm:$0xff]  ;;  %v393_v21 = vld [vmem:[%s1288_s26 + $0x38] sm:$0xff] }
  0x18   : > { %v401_v22 = vld [vmem:[%s1288_s26 + $0x78] sm:$0xff]  ;;  %v601_v23 = vld [vmem:[%s1302_s7 + $0x20] sm:$0xff]  ;;  %v603_v25 = vld [vmem:[%s1302_s7 + $0x30] sm:$0xff] }
  0x19   : > { %1159 = vmatmul.mubr.msk.f32.gmra.mrb[2].mxu0 %vm403_vm0, %v389_v8  ;;  %1171 = vmatmul.mubr.msk.f32.gmra.mrb[2].mxu1 %vm403_vm0, %v397_v9  ;;  %v604_v24 = vld [vmem:[%s1302_s7 + $0x38] sm:$0xff]  ;;  %v606_v26 = vld [vmem:[%s1302_s7 + $0x48] sm:$0xff]  ;;  %v605_v27 = vld [vmem:[%s1302_s7 + $0x40] sm:$0xff] }
  0x1a   : > { %1161 = vmatprep.mubr.msk.f32.mxu0 %vm403_vm0, %v390_v10  ;;  %1173 = vmatprep.mubr.msk.f32.mxu1 %vm403_vm0, %v398_v11  ;;  %v608_v28 = vld [vmem:[%s1302_s7 + $0x58] sm:$0xff]  ;;  %v607_v29 = vld [vmem:[%s1302_s7 + $0x50] sm:$0xff]  ;;  %v610_v30 = vld [vmem:[%s1302_s7 + $0x68] sm:$0xff] }
  0x1b   : > { %669 = vperm.xlu1 %1207, %v600_v14   ;;  %659 = vperm.xlu0 %1206, %v598_v19   ;;  %v609_v31 = vld [vmem:[%s1302_s7 + $0x60] sm:$0xff]  ;;  %v612_v32 = vld [vmem:[%s1302_s7 + $0x78] sm:$0xff]  ;;  %v611_v33 = vld [vmem:[%s1302_s7 + $0x70] sm:$0xff] }
  0x1c   : > { %v1358_v44 = vld [vmem:[%s367_s10] ss:$0 sm:$0xff] }
  0x1d   : > { %1162 = vmatmul.mubr.msk.f32.gmra.mrb[4].mxu0 %vm403_vm0, %v391_v15  ;;  %1174 = vmatmul.mubr.msk.f32.gmra.mrb[4].mxu1 %vm403_vm0, %v399_v16 }
  0x1e   : > { %1164 = vmatprep.mubr.msk.f32.mxu0 %vm403_vm0, %v392_v17  ;;  %1176 = vmatprep.mubr.msk.f32.mxu1 %vm403_vm0, %v400_v18 }
  0x1f   : > { %679 = vperm.xlu1 %1207, %v602_v20   ;;  %674 = vperm.xlu0 %1206, %v601_v23  }
  0x21   : > { %1165 = vmatmul.mubr.msk.f32.gmra.mrb[6].mxu0 %vm403_vm0, %v393_v21  ;;  %1177 = vmatmul.mubr.msk.f32.gmra.mrb[6].mxu1 %vm403_vm0, %v401_v22 }
  0x23   : > { %689 = vperm.xlu1 %1207, %v604_v24   ;;  %684 = vperm.xlu0 %1206, %v603_v25  }
  0x27   : > { %699 = vperm.xlu1 %1207, %v606_v26   ;;  %694 = vperm.xlu0 %1206, %v605_v27  }
  0x2b   : > { %709 = vperm.xlu1 %1207, %v608_v28   ;;  %704 = vperm.xlu0 %1206, %v607_v29  }
  0x2f   : > { %719 = vperm.xlu1 %1207, %v610_v30   ;;  %714 = vperm.xlu0 %1206, %v609_v31  }
  0x33   : > { %729 = vperm.xlu1 %1207, %v612_v32   ;;  %724 = vperm.xlu0 %1206, %v611_v33  }
  0x96   : > { %v1346_v34 = vpop.permute.xlu1 %664  ;;  %v655_v35 = vpop.permute.xlu0 %654 }
  0x9a   : > { %v670_v36 = vpop.permute.xlu1 %669  ;;  %v660_v37 = vpop.permute.xlu0 %659 }
  0x9e   : > { %v680_v38 = vpop.permute.xlu1 %679  ;;  %v1348_v39 = vpop.permute.xlu0 %674 }
  0xa2   : > { %v1350_v40 = vpop.permute.xlu1 %689  ;;  %v1352_v41 = vpop.permute.xlu0 %684 }
  0xa6   : > { %v700_v42 = vpop.permute.xlu1 %699  ;;  %v695_v43 = vpop.permute.xlu0 %694 }
  0xaa   : > { %v710_v1 = vpop.permute.xlu1 %709  ;;  %v705_v2 = vpop.permute.xlu0 %704 }
  0xae   : > { %v720_v31 = vpop.permute.xlu1 %719 }
  0xe8   : > { %v1157_v45 = vpop.f32.mrb[0].mxu0  ;;  %v1169_v46 = vpop.f32.mrb[0].mxu1 }
  0xe9   : > { %v615_v47 = vmul.f32 2.0, %v1157_v45  ;;  %v623_v48 = vmul.f32 2.0, %v1169_v46  ;;  %v518_v49 = vpop.f32.mrb[1].mxu0  ;;  %v558_v50 = vpop.f32.mrb[1].mxu1 }
  0xea   : > { %v614_v51 = vmul.f32 2.0, %v518_v49  ;;  %v622_v52 = vmul.f32 2.0, %v558_v50 }
  0xeb   : > { %v637_v53 = vsub.f32 %v1358_v44, %v615_v47  ;;  %v645_v54 = vsub.f32 %v1358_v44, %v623_v48 }
  0xec   : > { %v636_v55 = vsub.f32 %v1358_v44, %v614_v51  ;;  %v1160_v56 = vpop.f32.mrb[2].mxu0  ;;  %v1172_v57 = vpop.f32.mrb[2].mxu1  ;;  %v644_v58 = vsub.f32 %v1358_v44, %v622_v52 }
  0xed   : > { %v617_v59 = vmul.f32 2.0, %v1160_v56  ;;  %v528_v60 = vpop.f32.mrb[3].mxu0  ;;  %v568_v61 = vpop.f32.mrb[3].mxu1  ;;  %v741_v62 = vadd.f32 %v700_v42, %v645_v54  ;;  %v733_v63 = vadd.f32 %v660_v37, %v637_v53  ;;  %v625_v3 = vmul.f32 2.0, %v1172_v57 }
  0xee   : > { %v624_v0 = vmul.f32 2.0, %v568_v61  ;;  %v616_v5 = vmul.f32 2.0, %v528_v60  ;;  %v740_v13 = vadd.f32 %v695_v43, %v644_v58  ;;  %v732_v14 = vadd.f32 %v655_v35, %v636_v55  ;;  %v715_v42 = vpop.permute.xlu0 %714  ;;  %v730_v57 = vpop.permute.xlu1 %729 }
  0xef   : > { %766 = vmin.xlane.f32.xlu0 %v741_v62  ;;  %750 = vmin.xlane.f32.xlu1 %v733_v63  ;;  %v639_v4 = vsub.f32 %v1358_v44, %v617_v59  ;;  %v647_v17 = vsub.f32 %v1358_v44, %v625_v3 }
  0xf0   : > { %v646_v6 = vsub.f32 %v1358_v44, %v624_v0  ;;  %v1163_v7 = vpop.f32.mrb[4].mxu0  ;;  %v1175_v8 = vpop.f32.mrb[4].mxu1  ;;  %v638_v19 = vsub.f32 %v1358_v44, %v616_v5 }
  0xf1   : > { %v619_v9 = vmul.f32 2.0, %v1163_v7  ;;  %v627_v10 = vmul.f32 2.0, %v1175_v8  ;;  %v538_v11 = vpop.f32.mrb[5].mxu0  ;;  %v578_v12 = vpop.f32.mrb[5].mxu1  ;;  %v735_v24 = vadd.f32 %v670_v36, %v639_v4  ;;  %v743_v46 = vadd.f32 %v710_v1, %v647_v17 }
  0xf2   : > { %v618_v15 = vmul.f32 2.0, %v538_v11  ;;  %v626_v16 = vmul.f32 2.0, %v578_v12  ;;  %v742_v23 = vadd.f32 %v705_v2, %v646_v6  ;;  %v734_v48 = vadd.f32 %v1346_v34, %v638_v19  ;;  %v725_v34 = vpop.permute.xlu0 %724 }
  0xf3   : > { %v641_v18 = vsub.f32 %v1358_v44, %v619_v9  ;;  %764 = vmin.xlane.f32.xlu1 %v740_v13  ;;  %748 = vmin.xlane.f32.xlu0 %v732_v14  ;;  %v649_v25 = vsub.f32 %v1358_v44, %v627_v10  ;;  %v796_v8 = vlaneseq }
  0xf4   : > { %v640_v20 = vsub.f32 %v1358_v44, %v618_v15  ;;  %v1166_v21 = vpop.f32.mrb[6].mxu0  ;;  %v1178_v22 = vpop.f32.mrb[6].mxu1  ;;  %v648_v32 = vsub.f32 %v1358_v44, %v626_v16 }
  0xf5   : > { %v621_v26 = vmul.f32 2.0, %v1166_v21  ;;  %v629_v27 = vmul.f32 2.0, %v1178_v22  ;;  %v548_v28 = vpop.f32.mrb[7].mxu0  ;;  %v588_v29 = vpop.f32.mrb[7].mxu1  ;;  %v737_v30 = vadd.f32 %v680_v38, %v641_v18  ;;  %v745_v50 = vadd.f32 %v720_v31, %v649_v25 }
  0xf6   : > { %v620_v33 = vmul.f32 2.0, %v548_v28  ;;  %v628_v35 = vmul.f32 2.0, %v588_v29  ;;  %v736_v37 = vadd.f32 %v1348_v39, %v640_v20  ;;  %v744_v53 = vadd.f32 %v715_v42, %v648_v32 }
  0xf7   : > { %v643_v43 = vsub.f32 %v1358_v44, %v621_v26  ;;  %768 = vmin.xlane.f32.xlu1 %v742_v23  ;;  %754 = vmin.xlane.f32.xlu0 %v735_v24  ;;  %v910_v36 = vmin.f32 %v733_v63, %v737_v30  ;;  %v651_v38 = vsub.f32 %v1358_v44, %v629_v27  ;;  %v797_v11 = vand.u32 127, %v796_v8 }
  0xf8   : > { %v642_v45 = vsub.f32 %v1358_v44, %v620_v33  ;;  %v909_v47 = vmin.f32 %v732_v14, %v736_v37  ;;  %v650_v39 = vsub.f32 %v1358_v44, %v628_v35  ;;  %v1386_v14 = vshrl.u32 %v796_v8, 7 }
  0xf9   : > { %v739_v49 = vadd.f32 %v1350_v40, %v643_v43  ;;  %v914_v51 = vmin.f32 %v910_v36, %v741_v62  ;;  %v747_v60 = vadd.f32 %v730_v57, %v651_v38  ;;  %v802_v15 = vadd.s32 4294967288, %v797_v11 }
  0xfa   : > { %v738_v52 = vadd.f32 %v1352_v41, %v642_v45  ;;  %v913_v54 = vmin.f32 %v909_v47, %v740_v13  ;;  %v746_v63 = vadd.f32 %v725_v34, %v650_v39  ;;  %v809_v18 = vadd.s32 4294967280, %v797_v11 }
  0xfb   : > { %770 = vmin.xlane.f32.xlu0 %v743_v46  ;;  %756 = vmin.xlane.f32.xlu1 %v736_v37  ;;  %v912_v55 = vmin.f32 %v735_v24, %v739_v49  ;;  %v918_v56 = vmin.f32 %v914_v51, %v745_v50  ;;  %v800_v19 = vsub.s32 %v797_v11, %v1386_v14  ;;  %v816_v20 = vadd.s32 4294967272, %v797_v11 }
  0xfc   : > { %v911_v58 = vmin.f32 %v734_v48, %v738_v52  ;;  %v917_v59 = vmin.f32 %v913_v54, %v744_v53  ;;  %v823_v21 = vadd.s32 4294967264, %v797_v11  ;;  %v805_v22 = vsub.s32 %v802_v15, %v1386_v14 }
  0xfd   : > { %v916_v61 = vmin.f32 %v912_v55, %v743_v46  ;;  %v812_v25 = vsub.s32 %v809_v18, %v1386_v14  ;;  %v830_v26 = vadd.s32 4294967256, %v797_v11  ;;  %v819_v28 = vsub.s32 %v816_v20, %v1386_v14 }
  0xfe   : > { %v915_v40 = vmin.f32 %v911_v58, %v742_v23  ;;  %v921_v0 = vmin.f32 %v917_v59, %v918_v56  ;;  %v826_v29 = vsub.s32 %v823_v21, %v1386_v14  ;;  %v837_v32 = vadd.s32 4294967248, %v797_v11 }
  0xff   : > { %752 = vmin.xlane.f32.xlu0 %v734_v48  ;;  %760 = vmin.xlane.f32.xlu1 %v738_v52  ;;  %v920_v44 = vmin.f32 %v916_v61, %v747_v60  ;;  %v833_v37 = vsub.s32 %v830_v26, %v1386_v14  ;;  %v844_v42 = vadd.s32 4294967240, %v797_v11  ;;  %v851_v43 = vadd.s32 4294967232, %v797_v11 }
 0x100   : > { %v919_v41 = vmin.f32 %v915_v40, %v746_v63  ;;  %v858_v46 = vadd.s32 4294967224, %v797_v11  ;;  %v865_v38 = vadd.s32 4294967216, %v797_v11  ;;  %v872_v39 = vadd.s32 4294967208, %v797_v11 }
 0x101   : > { %v847_v54 = vsub.s32 %v844_v42, %v1386_v14  ;;  %v854_v55 = vsub.s32 %v851_v43, %v1386_v14  ;;  %v879_v56 = vadd.s32 4294967200, %v797_v11  ;;  %v886_v34 = vadd.s32 4294967192, %v797_v11 }
 0x102   : > { %v922_v62 = vmin.f32 %v919_v41, %v920_v44  ;;  %v861_v57 = vsub.s32 %v858_v46, %v1386_v14  ;;  %v893_v40 = vadd.s32 4294967184, %v797_v11  ;;  %v900_v41 = vadd.s32 4294967176, %v797_v11 }
 0x103   : > { %758 = vmin.xlane.f32.xlu0 %v737_v30  ;;  %772 = vmin.xlane.f32.xlu1 %v744_v53 }
 0x104   : > { %v923_v1 = vmin.f32 %v921_v0, %v922_v62  ;;  %v875_v0 = vsub.s32 %v872_v39, %v1386_v14  ;;  %v896_v8 = vsub.s32 %v893_v40, %v1386_v14  ;;  %v903_v15 = vsub.s32 %v900_v41, %v1386_v14 }
 0x106   : > { %v924_v2 = vrot.slane %v923_v1, 4 }
 0x107   : > { %762 = vmin.xlane.f32.xlu0 %v739_v49  ;;  %776 = vmin.xlane.f32.xlu1 %v746_v63 }
 0x108   : > { %v925_v3 = vmin.f32 %v923_v1, %v924_v2  ;;  %v882_v1 = vsub.s32 %v879_v56, %v1386_v14 }
 0x10a   : > { %v926_v4 = vrot.slane %v925_v3, 2 }
 0x10b   : > { %774 = vmin.xlane.f32.xlu0 %v745_v50  ;;  %v840_v50 = vsub.s32 %v837_v32, %v1386_v14 }
 0x10c   : > { %v927_v5 = vmin.f32 %v925_v3, %v926_v4 }
 0x10e   : > { %v928_v6 = vrot.slane %v927_v5, 1 }
 0x10f   : > { %778 = vmin.xlane.f32.xlu0 %v747_v60  ;;  %v868_v60 = vsub.s32 %v865_v38, %v1386_v14 }
 0x110   : > { %v929_v7 = vmin.f32 %v927_v5, %v928_v6  ;;  %v889_v5 = vsub.s32 %v886_v34, %v1386_v14 }
 0x112   : > { %930 = vst [vmem:[%s385_s13] sm:$0x1] %v929_v7 }
 0x17c   : > { %v1384_v9 = vpop.xlane.xlu0 %766  ;;  %v751_v10 = vpop.xlane.xlu1 %750 }
 0x17d   : > { %v806_v30 = vrot.slane %v751_v10, %v805_v22  ;;  %v862_v3 = vrot.slane %v1384_v9, %v861_v57 }
 0x180   : > { %v765_v12 = vpop.xlane.xlu1 %764  ;;  %v749_v13 = vpop.xlane.xlu0 %748 }
 0x181   : > { %v801_v27 = vrot.slane %v749_v13, %v800_v19  ;;  %v855_v62 = vrot.slane %v765_v12, %v854_v55 }
 0x183   : > { %v808_v36 = vsel %vm807_vm1, %v806_v30, %v801_v27 }
 0x184   : > { %v1388_v16 = vpop.xlane.xlu1 %768  ;;  %v755_v17 = vpop.xlane.xlu0 %754 }
 0x185   : > { %v820_v45 = vrot.slane %v755_v17, %v819_v28  ;;  %v869_v6 = vrot.slane %v1388_v16, %v868_v60 }
 0x188   : > { %v771_v23 = vpop.xlane.xlu0 %770  ;;  %v757_v24 = vpop.xlane.xlu1 %756 }
 0x189   : > { %v827_v47 = vrot.slane %v757_v24, %v826_v29  ;;  %v876_v13 = vrot.slane %v771_v23, %v875_v0 }
 0x18c   : > { %v753_v31 = vpop.xlane.xlu0 %752  ;;  %v761_v35 = vpop.xlane.xlu1 %760 }
 0x18d   : > { %v813_v33 = vrot.slane %v753_v31, %v812_v25  ;;  %v841_v61 = vrot.slane %v761_v35, %v840_v50 }
 0x18f   : > { %v815_v48 = vsel %vm814_vm2, %v813_v33, %v808_v36 }
 0x190   : > { %v822_v49 = vsel %vm821_vm3, %v820_v45, %v815_v48  ;;  %v759_v51 = vpop.xlane.xlu0 %758  ;;  %v773_v59 = vpop.xlane.xlu1 %772 }
 0x191   : > { %v829_v52 = vsel %vm828_vm4, %v827_v47, %v822_v49  ;;  %v834_v53 = vrot.slane %v759_v51, %v833_v37  ;;  %v883_v17 = vrot.slane %v773_v59, %v882_v1 }
 0x193   : > { %v836_v58 = vsel %vm835_vm5, %v834_v53, %v829_v52 }
 0x194   : > { %v763_v63 = vpop.xlane.xlu0 %762  ;;  %v843_v2 = vsel %vm842_vm6, %v841_v61, %v836_v58  ;;  %v777_v12 = vpop.xlane.xlu1 %776 }
 0x195   : > { %v848_v44 = vrot.slane %v763_v63, %v847_v54  ;;  %v897_v20 = vrot.slane %v777_v12, %v896_v8 }
 0x197   : > { %v850_v4 = vsel %vm849_vm7, %v848_v44, %v843_v2 }
 0x198   : > { %v857_v7 = vsel %vm856_vm8, %v855_v62, %v850_v4  ;;  %v775_v10 = vpop.xlane.xlu0 %774 }
 0x199   : > { %v864_v11 = vsel %vm863_vm9, %v862_v3, %v857_v7  ;;  %v890_v19 = vrot.slane %v775_v10, %v889_v5 }
 0x19a   : > { %v871_v9 = vsel %vm870_vm10, %v869_v6, %v864_v11 }
 0x19b   : > { %v878_v18 = vsel %vm877_vm11, %v876_v13, %v871_v9 }
 0x19c   : > { %v885_v16 = vsel %vm884_vm12, %v883_v17, %v878_v18  ;;  %v779_v21 = vpop.xlane.xlu0 %778 }
 0x19d   : > { %v892_v22 = vsel %vm891_vm13, %v890_v19, %v885_v16  ;;  %v904_v23 = vrot.slane %v779_v21, %v903_v15 }
 0x19e   : > { %v899_v24 = vsel %vm898_vm14, %v897_v20, %v892_v22 }
 0x19f   : > { %v906_v25 = vsel %vm905_vm15, %v904_v23, %v899_v24 }
 0x1a0   : > { %908 = vst [vmem:[%s376_s16] sm:$0x1] %v906_v25 }
 0x1a1 PF: > { %s16_s20 = sadd.s32 1, %s1230_s20   ;;  %s1427_s18 = smov %s1226_s19 }
 0x1a2   : > { %p13_p5 = scmp.ge.s32.totalorder %s16_s20, 4   ;;  %s1428_s19 = smov %s1430_s21 }
 0x1a4   :  { %15 = sbr.rel (!%p13_p5) target bundleno = 2 (0x2), region = 87 }

</bundles_post_ra>
